<compile_context>
chip_gen: v6e
topology: v6e:2x2x1
jax: 0.10.0
libtpu: 0.0.40
codegen_flags: <defaults>
</compile_context>

<pallas_src>
import numpy as np
import jax
import jax.numpy as jnp
from jax.experimental import pallas as pl
from jax.experimental.pallas import tpu as pltpu


# ---------------------------------------------------------------------------
# Parameter setup (matches the PyTorch / MAE reference implementation).
# ---------------------------------------------------------------------------
def get_1d_sincos_pos_embed_from_grid(embed_dim, pos):
    assert embed_dim % 2 == 0
    omega = np.arange(embed_dim // 2, dtype=float)
    omega /= embed_dim / 2.0
    omega = 1.0 / 10000 ** omega            # (D/2,)
    pos = pos.reshape(-1)                   # (M,)
    out = np.einsum("m,d->md", pos, omega)  # (M, D/2)
    emb_sin = np.sin(out)
    emb_cos = np.cos(out)
    return np.concatenate([emb_sin, emb_cos], axis=1)  # (M, D)


def get_2d_sincos_pos_embed_from_grid(embed_dim, grid):
    assert embed_dim % 2 == 0
    emb_h = get_1d_sincos_pos_embed_from_grid(embed_dim // 2, grid[0])
    emb_w = get_1d_sincos_pos_embed_from_grid(embed_dim // 2, grid[1])
    return np.concatenate([emb_h, emb_w], axis=1)       # (H*W, D)


def get_2d_sincos_pos_embed(embed_dim, grid_size, cls_token=False):
    grid_h = np.arange(grid_size, dtype=float)
    grid_w = np.arange(grid_size, dtype=float)
    grid = np.meshgrid(grid_w, grid_h, indexing="xy")
    grid = np.stack(grid, axis=0)
    grid = grid.reshape([2, 1, grid_size, grid_size])
    pos_embed = get_2d_sincos_pos_embed_from_grid(embed_dim, grid)
    if cls_token:
        pos_embed = np.concatenate([np.zeros([1, embed_dim]), pos_embed], axis=0)
    return pos_embed


def build_pos_embed_nchw(embed_dim, grid_size, dtype=jnp.float32):
    """pos_embed rearranged '(h w) d -> 1 d h w', in the requested dtype."""
    pe = get_2d_sincos_pos_embed(embed_dim, grid_size, cls_token=False)  # (H*W, D)
    pe = pe.reshape(grid_size, grid_size, embed_dim)                     # (H, W, D)
    pe = np.transpose(pe, (2, 0, 1))[None, ...]                          # (1, D, H, W)
    return jnp.asarray(pe, dtype=dtype)


# ---------------------------------------------------------------------------
# Tiling plan: view the per-image C*H*W elements as (S, L) with lane-dense L.
# ---------------------------------------------------------------------------
def _plan_tiling(flat, itemsize, max_block_bytes):
    """Return (S, L, TS):  C*H*W -> (S, L) with L a multiple of 128 when possible,
    and a sublane tile TS (multiple of 8 or == S) so one block is <= max_block_bytes."""
    lane = None
    for cand in (2048, 1024, 512, 256, 128):
        if flat % cand == 0:
            lane = cand
            break
    if lane is None:
        # Fallback: whole flattened row as a single lane-dim block (full-extent dims
        # are always legal).  Only hit when C*H*W is not a multiple of 128.
        return 1, flat, 1

    s = flat // lane
    max_rows = max(1, max_block_bytes // (lane * itemsize))
    if s <= max_rows:
        return s, lane, s                        # one chunk per image

    ts = (max_rows // 8) * 8
    if ts == 0:
        ts = min(s, 8)
    # Prefer a tile that divides S exactly (no partial edge blocks); otherwise the
    # last (partial) block is masked by Pallas, which is still correct elementwise.
    for cand in range(ts, 0, -8):
        if s % cand == 0:
            return s, lane, cand
    return s, lane, ts


# ---------------------------------------------------------------------------
# Pallas kernel:  out = x + gamma * pos_embed   on a lane-dense (TS, L) tile.
# ---------------------------------------------------------------------------
def _add_pos_kernel(gamma_ref, x_ref, pe_ref, o_ref):
    # gamma_ref: SMEM (1,) f32 scalar.  x_ref / pe_ref / o_ref: (TS, L) VMEM tiles.
    g = gamma_ref[0]
    o_ref[...] = (
        x_ref[...].astype(jnp.float32) + g * pe_ref[...].astype(jnp.float32)
    ).astype(o_ref.dtype)


def sincos_pos_embed_2d_forward(x, pos_embed, gamma, *, max_block_bytes=1 << 20):
    """x: [B, C, H, W]; pos_embed: [1, C, H, W]; gamma: scalar.  Returns x-dtype output."""
    B, C, H, W = x.shape
    flat = C * H * W
    dtype = x.dtype
    itemsize = jnp.dtype(dtype).itemsize

    S, L, TS = _plan_tiling(flat, itemsize, max_block_bytes)
    num_chunks = pl.cdiv(S, TS)

    # Pure layout plumbing (free): lane-dense 2-D/3-D views, activation dtype for pe.
    x3 = x.reshape(B, S, L)
    pe2 = pos_embed.astype(dtype).reshape(S, L)
    gamma_arr = jnp.asarray(gamma, dtype=jnp.float32).reshape((1,))

    out = pl.pallas_call(
        _add_pos_kernel,
        out_shape=jax.ShapeDtypeStruct((B, S, L), dtype),
        # Chunk axis OUTER, batch INNER: pos_embed's block index only changes every
        # B steps, so the shared table is DMA'd once per chunk, not once per image.
        grid=(num_chunks, B),
        in_specs=[
            pl.BlockSpec(memory_space=pltpu.SMEM),                     # gamma scalar
            pl.BlockSpec((None, TS, L), lambda c, b: (b, c, 0)),       # x tile (batch squeezed)
            pl.BlockSpec((TS, L), lambda c, b: (c, 0)),                # shared pos_embed tile
        ],
        out_specs=pl.BlockSpec((None, TS, L), lambda c, b: (b, c, 0)),
        compiler_params=pltpu.CompilerParams(
            dimension_semantics=("parallel", "parallel"),
            vmem_limit_bytes=32 * 1024 * 1024,
        ),
    )(gamma_arr, x3, pe2)

    return out.reshape(B, C, H, W)


# ---------------------------------------------------------------------------
# Demo / correctness checks
# ---------------------------------------------------------------------------
if __name__ == "__main__":
    key = jax.random.PRNGKey(0)

    # --- Test 1: module-sized small case, f32 (matches PyTorch .float() buffer). ---
    batch, embed_dim, grid_size = 2, 8, 16
    k1, k2, k3 = jax.random.split(key, 3)
    x = jax.random.normal(k1, (batch, embed_dim, grid_size, grid_size), dtype=jnp.float32)
    gamma = jnp.float32(1.0)
    pos_embed = build_pos_embed_nchw(embed_dim, grid_size, dtype=jnp.float32)

    out = jax.block_until_ready(sincos_pos_embed_2d_forward(x, pos_embed, gamma))
    ref = x + gamma * pos_embed
    np.testing.assert_allclose(np.asarray(out), np.asarray(ref), rtol=1e-6, atol=1e-6)

    # --- Test 2: force multi-chunk tiling (chunk-outer / batch-inner path). ---
    batch2, embed_dim2, grid_size2 = 2, 8, 64          # flat = 32768 -> S=16, L=2048
    x2 = jax.random.normal(k2, (batch2, embed_dim2, grid_size2, grid_size2), dtype=jnp.float32)
    gamma2 = jnp.float32(0.5)
    pos_embed2 = build_pos_embed_nchw(embed_dim2, grid_size2, dtype=jnp.float32)
    out2 = jax.block_until_ready(
        sincos_pos_embed_2d_forward(x2, pos_embed2, gamma2, max_block_bytes=64 * 1024)
    )
    ref2 = x2 + gamma2 * pos_embed2
    np.testing.assert_allclose(np.asarray(out2), np.asarray(ref2), rtol=1e-6, atol=1e-6)

    # --- Test 3: bf16 activations — HBM traffic stays bf16, compute in f32. ---
    x3 = jax.random.normal(k3, (batch, embed_dim, grid_size, grid_size), dtype=jnp.bfloat16)
    pe_bf16 = pos_embed.astype(jnp.bfloat16)
    out3 = jax.block_until_ready(sincos_pos_embed_2d_forward(x3, pos_embed, gamma))
    ref3 = (x3.astype(jnp.float32) + gamma * pe_bf16.astype(jnp.float32)).astype(jnp.bfloat16)
    np.testing.assert_allclose(
        np.asarray(out3, dtype=np.float32), np.asarray(ref3, dtype=np.float32),
        rtol=5e-2, atol=5e-2)

    print("KERNEL_OK")
</pallas_src>

<mosaic_0001>
module attributes {stable_mosaic.version = 11 : i64} {
  func.func @_add_pos_kernel(%arg0: i32, %arg1: i32, %arg2: memref<1xf32, #tpu.memory_space<smem>>, %arg3: memref<1x1x2048xf32, #tpu.memory_space<vmem>>, %arg4: memref<1x2048xf32, #tpu.memory_space<vmem>>, %arg5: memref<1x1x2048xf32, #tpu.memory_space<vmem>>) attributes {dimension_semantics = [#tpu.dimension_semantics<parallel>, #tpu.dimension_semantics<parallel>], iteration_bounds = array<i64: 1, 2>, scalar_prefetch = 0 : i64, scratch_operands = 0 : i64, tpu.core_type = #tpu.core_type<tc>, window_params = [{transform_indices = @transform_0, window_bounds = array<i64: 1>}, {transform_indices = @transform_1, window_bounds = array<i64: 1, 1, 2048>}, {transform_indices = @transform_2, window_bounds = array<i64: 1, 2048>}, {transform_indices = @transform_3, window_bounds = array<i64: 1, 1, 2048>}]} {
    %c0 = arith.constant 0 : index
    %0 = memref.load %arg2[%c0] : memref<1xf32, #tpu.memory_space<smem>>
    %c0_0 = arith.constant 0 : index
    %c0_1 = arith.constant 0 : index
    %c0_2 = arith.constant 0 : index
    %1 = vector.load %arg3[%c0_0, %c0_1, %c0_2] : memref<1x1x2048xf32, #tpu.memory_space<vmem>>, vector<1x1x2048xf32>
    %2 = vector.shape_cast %1 : vector<1x1x2048xf32> to vector<1x2048xf32>
    %c0_3 = arith.constant 0 : index
    %c0_4 = arith.constant 0 : index
    %3 = vector.load %arg4[%c0_3, %c0_4] : memref<1x2048xf32, #tpu.memory_space<vmem>>, vector<1x2048xf32>
    %4 = vector.broadcast %0 : f32 to vector<1x2048xf32>
    %5 = arith.mulf %4, %3 : vector<1x2048xf32>
    %6 = arith.addf %2, %5 : vector<1x2048xf32>
    %c0_5 = arith.constant 0 : index
    %c0_6 = arith.constant 0 : index
    %c0_7 = arith.constant 0 : index
    %7 = vector.load %arg5[%c0_5, %c0_6, %c0_7] : memref<1x1x2048xf32, #tpu.memory_space<vmem>>, vector<1x1x2048xf32>
    %8 = vector.shape_cast %7 : vector<1x1x2048xf32> to vector<1x2048xf32>
    %9 = vector.shape_cast %6 : vector<1x2048xf32> to vector<1x1x2048xf32>
    tpu.vector_store %arg5[%c0_5, %c0_6, %c0_7], %9 {strides = array<i32>} : memref<1x1x2048xf32, #tpu.memory_space<vmem>>, vector<1x1x2048xf32>,
    return
  }
  func.func @transform_0(%arg0: i32, %arg1: i32) -> i32 {
    %c0_i32 = arith.constant 0 : i32
    %c0_i32_0 = arith.constant 0 : i32
    return %c0_i32 : i32
  }
  func.func @transform_1(%arg0: i32, %arg1: i32) -> (i32, i32, i32) {
    %c0_i32 = arith.constant 0 : i32
    %c0_i32_0 = arith.constant 0 : i32
    return %arg1, %arg0, %c0_i32 : i32, i32, i32
  }
  func.func @transform_2(%arg0: i32, %arg1: i32) -> (i32, i32) {
    %c0_i32 = arith.constant 0 : i32
    %c0_i32_0 = arith.constant 0 : i32
    return %arg0, %c0_i32 : i32, i32
  }
  func.func @transform_3(%arg0: i32, %arg1: i32) -> (i32, i32, i32) {
    %c0_i32 = arith.constant 0 : i32
    %c0_i32_0 = arith.constant 0 : i32
    return %arg1, %arg0, %c0_i32 : i32, i32, i32
  }
}

</mosaic_0001>

<bundles_post_ra>
// kernel: tpu_custom_call.1
= control target key start
LH: loop header
LB: loop body
LE: loop exit
PB: predicated region body
PF: predicated region fallthrough
CT: control target
= control target key end

     0   :  { %s777_s0 = inlined_call_operand.<no memory space> [shape: f32[1], index: 0, kind: input, shape index: {}]   ;;  %s778_s1 = inlined_call_operand.hbm [shape: f32[2,1,2048], index: 1, kind: input, shape index: {}]   ;;  %s779_s2 = inlined_call_operand.hbm [shape: f32[1,2048], index: 2, kind: input, shape index: {}]   ;;  %s780_s3 = inlined_call_operand.hbm [shape: f32[2,1,2048], index: 3, kind: output, shape index: {}]  }
   0x1   :  { %8 = sst [smem:[#allocation2]] %s777_s0 }
   0x2   :  { %9 = vsyncpa [#allocation4], 0 }
   0x3   :  { %11 = vsyncpa [#allocation4 + $0x1], 0 }
   0x4   :  { %12 = vsyncpa [#allocation7], 0 }
   0x5   :  { %13 = vsyncpa [#allocation5], 0 }
   0x6   :  { %15 = vsyncpa [#allocation5 + $0x1], 0  ;;  %s610_s14 = smov 0   ;;  %s612_s15 = smov 0  }
   0x7   :  { %s614_s16 = smov 0   ;;  %s616_s17 = smov 0  }
   0x8   :  { %s618_s18 = smov 0   ;;  %s620_s19 = smov 0  }
   0x9 LB: > { %s352_s0 = sadd.s32 4294967295, %s582_s19   ;;  %s353_s20 = sadd.s32 4294967294, %s582_s19   ;;  %s582_s19 = sphi %s620_s19, %s21_s19   ;;  %s578_s18 = sphi %s618_s18, %s797_s18   ;;  %s574_s17 = sphi %s616_s17, %s796_s17   ;;  %s570_s16 = sphi %s614_s16, %s795_s16   ;;  %s566_s15 = sphi %s612_s15, %s794_s15   ;;  %s562_s14 = sphi %s610_s14, %s793_s14  }
   0xa   : > { %p76_p0 = scmp.ne.s32.totalorder %s566_s15, %s562_s14  ;;  %p644_p1 = scmp.eq.s32.totalorder %s352_s0, 0 }
   0xb   : > { %p648_p2 = scmp.eq.s32.totalorder %s352_s0, 1  ;;  %p134_p3 = scmp.eq.s32.totalorder %s353_s20, 1 }
   0xc   : > { %p654_p4 = por %p644_p1, %p76_p0  ;;  %p354_p5 = scmp.ge.s32.totalorder %s582_s19, 1 }
   0xd   : > { %p659_p6 = por %p134_p3, %p76_p0  ;;  %p141_p7 = scmp.lt.s32.totalorder %s582_s19, 3 }
   0xe   : > { %s784_s23 = scalar_select %p654_p4, 1, 0 }
   0xf   : > { %s785_s24 = scalar_select %p659_p6, 1, 0 }
  0x10   : > { %p664_p8 = pnand %p354_p5, %p141_p7  ;;  %s584_s26 = smov [#allocation6]  }
  0x11   : > { %s160_s27 = sshll.u32 %s584_s26, 4  ;;  %s30_s29 = sadd.s32 1, %s578_s18  ;;  %s161_s27 = int_to_ptr.vmem [resolvable:$true] %s160_s27 }
  0x12   : > { %p379_p10 = pneg %p664_p8  ;;  %s63_s30 = sadd.s32 1, %s570_s16 }
  0x13   : > { %p31_p12 = scmp.ge.s32.totalorder %s30_s29, 2  ;;  %s455_s4 = scalar_lea.vmem %s161_s27, 256 }
  0x14   : > { %p673_p11 = pnand %p379_p10, %p644_p1  ;;  %p456_p0 = scmp.ne.s32.totalorder %s161_s27, %s455_s4 }
  0x15   : > { %p463_p7 = scmp.lt.s32.totalorder %s161_s27, %s161_s27  ;;  %p464_p6 = scmp.lt.s32.totalorder %s455_s4, %s455_s4 }
  0x16   : > { %p446_p13 = pneg %p673_p11 }
  0x17   : > { %p465_p9 = por %p464_p6, %p463_p7 }
  0x18   : > { %p458_p3 = pnand %p456_p0, %p446_p13 }
  0x1a   : > { %p459_p5 = pneg %p458_p3 }
  0x1c   : > { %p466_p4 = pnand %p465_p9, %p459_p5 }
  0x1e   : > { %469 = shalt.err (!%p466_p4)
}
  0x1f   : > { %382 = dma.hbm_to_vmem [thread:$0]  (!%p673_p11), %s779_s2, 256, %s161_s27, [#allocation7]  }
  0x20   : > { %s799_s29 = smov (%p31_p12, %s30_s29), 0  ;;  %p70_p6 = scmp.ne.s32.totalorder %s570_s16, %s566_s15 }
  0x21   : > { %p71_p4 = scmp.eq.s32.totalorder %s582_s19, 0  ;;  %s58_s7 = ssub.s32 %s578_s18, %s799_s29 }
  0x22   : > { %p392_p9 = scmp.lt.s32.totalorder %s582_s19, 2  ;;  %p61_p10 = scmp.eq.s32.totalorder %s58_s7, 0 }
  0x23   : > { %p72_p13 = por %p71_p4, %p70_p6  ;;  %p696_p0 = por %p648_p2, %p70_p6 }
  0x24   : > { %s171_s9 = sand.u32 1, %s570_s16   ;;  %s369_s12 = sshll.u32 %s578_s18, 8 }
  0x25   : > { %s702_s10 = scalar_select %p61_p10, %s570_s16, %s63_s30  }
  0x26   : > { %s357_s11 = sshll.u32 %s171_s9, 4  ;;  %s183_s20 = scalar_lea.hbm %s778_s1, %s369_s12 }
  0x27   : > { %s175_s26 = scalar_lea.vmem [#allocation3], %s357_s11  ;;  %p708_p11 = pnand %p392_p9, %p72_p13 }
  0x28   : > { %s185_s27 = sshll.u32 %s175_s26, 4  ;;  %s172_s22 = scalar_lea.sflag [#allocation4], %s171_s9  ;;  %s186_s27 = int_to_ptr.vmem [resolvable:$true] %s185_s27 }
  0x29   : > { %p472_p2 = pneg %p708_p11  ;;  %s483_s4 = scalar_lea.vmem %s186_s27, 256 }
  0x2a   : > { %p484_p12 = scmp.ne.s32.totalorder %s186_s27, %s483_s4  ;;  %s585_s30 = smov [#allocation3]  }
  0x2b   : > { %s488_s5 = sshll.u32 %s585_s30, 4  ;;  %s489_s5 = int_to_ptr.vmem [resolvable:$false] %s488_s5 }
  0x2c   : > { %p486_p3 = pnand %p484_p12, %p472_p2  ;;  %s490_s6 = scalar_lea.vmem %s489_s5, 512 }
  0x2d   : > { %p491_p7 = scmp.lt.s32.totalorder %s186_s27, %s489_s5  ;;  %p492_p6 = scmp.lt.s32.totalorder %s490_s6, %s483_s4 }
  0x2e   : > { %p487_p5 = pneg %p486_p3 }
  0x2f   : > { %p493_p4 = por %p492_p6, %p491_p7 }
  0x31   : > { %p494_p10 = pnand %p493_p4, %p487_p5 }
  0x33   : > { %497 = shalt.err (!%p494_p10)
}
  0x34   : > { %386 = dma.hbm_to_vmem [thread:$0]  (!%p708_p11), %s183_s20, 256, %s186_s27, %s172_s22  }
  0x35   : > { %194 = sbr.rel (%p664_p8) target bundleno = 85 (0x55), region = 32  ;;  %s719_s7 = sand.u32 (!%p664_p8), 1, %s566_s15  }
  0x36   : > { %s361_s9 = sshll.u32 (!%p664_p8), %s719_s7, 4  ;;  %s197_s11 = scalar_lea.sflag (!%p664_p8), [#allocation4], %s719_s7 }
  0x37   : > { %s200_s12 = scalar_lea.vmem (!%p664_p8), [#allocation3], %s361_s9  ;;  %p790_p9 = scmp.ne.s32.totalorder (!%p664_p8), %s784_s23, 0 }
  0x3a   : > { %549 = dma.done.wait (%p790_p9), %s197_s11, 256  }
  0x3b   : > { %551 = vsyncadd (%p790_p9), %s197_s11, 4294967040 }
  0x3c   : > { %553 = dma.done.wait (%p644_p1), [#allocation7], 256  }
  0x3d   : > { %555 = vsyncadd (%p644_p1), [#allocation7], 4294967040  ;;  %s227_s25 = sld [smem:[#allocation2]]  ;;  %v228_v0 = vld [vmem:[%s200_s12] sm:$0xff]  ;;  %s226_s13 = scalar_lea.vmem [#allocation8], %s361_s9  ;;  %v229_v4 = vld [vmem:[%s200_s12 + $0x8] sm:$0xff] }
  0x3e   : > { %v230_v1 = vld [vmem:[#allocation6] sm:$0xff]  ;;  %s256_s0 = sshll.u32 %s226_s13, 4  ;;  %v231_v5 = vld [vmem:[#allocation6 + $0x8] sm:$0xff]  ;;  %s370_s23 = sshll.u32 %s574_s17, 8  ;;  %s732_s0 = int_to_ptr.vmem [resolvable:$true] %s256_s0 }
  0x3f   : > { %s254_s26 = scalar_lea.hbm %s780_s3, %s370_s23  ;;  %s240_s27 = scalar_lea.sflag [#allocation5], %s719_s7 }
  0x40   : > { %s498_s28 = scalar_lea.vmem %s732_s0, 256  ;;  %s586_s17 = smov [#allocation8]  }
  0x41   : > { %p499_p1 = scmp.ne.s32.totalorder %s732_s0, %s498_s28  ;;  %s502_s22 = sshll.u32 %s586_s17, 4  ;;  %s503_s22 = int_to_ptr.vmem [resolvable:$false] %s502_s22 }
  0x42   : > { %s504_s4 = scalar_lea.vmem %s503_s22, 512  ;;  %p505_p11 = scmp.lt.s32.totalorder %s732_s0, %s503_s22 }
  0x43   : > { %v232_v2 = vstv %s227_s25  ;;  %p500_p8 = pnand %p499_p1, %p696_p0  ;;  %p506_p2 = scmp.lt.s32.totalorder %s504_s4, %s498_s28 }
  0x44   : > { %v233_v3 = vmul.f32 %v232_v2, %v230_v1  ;;  %v234_v6 = vmul.f32 %v232_v2, %v231_v5 }
  0x45   : > { %p501_p13 = pneg %p500_p8  ;;  %p507_p12 = por %p506_p2, %p505_p11 }
  0x46   : > { %v235_v7 = vadd.f32 %v233_v3, %v228_v0  ;;  %v236_v8 = vadd.f32 %v234_v6, %v229_v4 }
  0x47   : > { %p508_p3 = pnand %p507_p12, %p501_p13 }
  0x48   : > { %237 = vst [vmem:[%s226_s13] sm:$0xff] %v235_v7  ;;  %238 = vst [vmem:[%s226_s13 + $0x8] sm:$0xff] %v236_v8 }
  0x49   : > { %511 = shalt.err (!%p508_p3)
}
  0x4a   : > { %s512_s30 = scalar_lea.hbm %s254_s26, 256  ;;  %s516_s7 = scalar_lea.hbm %s780_s3, 512 }
  0x4b   : > { %p513_p5 = scmp.ne.s32.totalorder %s254_s26, %s512_s30  ;;  %p517_p4 = scmp.lt.s32.totalorder %s254_s26, %s780_s3 }
  0x4c   : > { %p518_p10 = scmp.lt.s32.totalorder %s516_s7, %s512_s30 }
  0x4d   : > { %p514_p7 = pnand %p513_p5, %p696_p0 }
  0x4e   : > { %p519_p9 = por %p518_p10, %p517_p4 }
  0x4f   : > { %p515_p6 = pneg %p514_p7 }
  0x51   : > { %p520_p1 = pnand %p519_p9, %p515_p6 }
  0x53   : > { %523 = shalt.err (!%p520_p1)
}
  0x54   : > { %377 = dma.vmem_to_hbm [thread:$0]  (%p696_p0), %s732_s0, 256, %s254_s26, %s240_s27  }
  0x55 PF: > { %s268_s12 = sand.u32 1, %s562_s14   ;;  %p791_p8 = scmp.ne.s32.totalorder %s785_s24, 0 }
  0x56   : > { %p792_p13 = scmp.ge.s32.totalorder %s582_s19, 2  ;;  %s269_s25 = scalar_lea.sflag [#allocation5], %s268_s12 }
  0x58   : > { %p388_p11 = pnand %p792_p13, %p791_p8 }
  0x5a   : > { %p389_p2 = pneg %p388_p11 }
  0x5c   : > { %557 = dma.done.wait (%p389_p2), %s269_s25, 256  }
  0x5d   : > { %559 = vsyncadd (%p389_p2), %s269_s25, 4294967040  ;;  %s21_s19 = sadd.s32 1, %s582_s19   ;;  %s793_s14 = smov %s566_s15 }
  0x5e   : > { %p18_p12 = scmp.ge.s32.totalorder %s21_s19, 4   ;;  %s794_s15 = smov %s570_s16 }
  0x5f   : > { %s795_s16 = smov %s702_s10  ;;  %s796_s17 = smov %s578_s18 }
  0x60   : > { %s797_s18 = smov %s799_s29  ;;  %20 = sbr.rel (!%p18_p12) target bundleno = 9 (0x9), region = 82 }
  0x65   :  { %274 = vsyncpa [#allocation4], 1 }
  0x66   :  { %276 = vsyncpa [#allocation4 + $0x1], 1 }
  0x67   :  { %277 = vsyncpa [#allocation7], 1 }
  0x68   :  { %278 = vsyncpa [#allocation5], 1 }
  0x69   :  { %280 = vsyncpa [#allocation5 + $0x1], 1 }

</bundles_post_ra>
